<compile_context>
chip_gen: v7x
topology: tpu7x:2x2x1
jax: 0.10.0
libtpu: 0.0.40
codegen_flags: <defaults>
</compile_context>

<pallas_src>
import math

import jax
import jax.numpy as jnp
from jax.experimental import pallas as pl
from jax.experimental.pallas import tpu as pltpu


# ---------------------------------------------------------------------------
# Kernel body
# ---------------------------------------------------------------------------
def spatial_attn_kernel(x_ref, w_ref, b_ref, out_ref):
    # x_ref:   (b_blk, c_in, hw_blk)  batch-block of flattened-spatial strips
    # w_ref:   (c_out, c_in)          conv weight with BN scale pre-folded (resident)
    # b_ref:   (c_out, 1)             conv bias + BN shift pre-folded, f32 (resident)
    # out_ref: (b_blk, c_out, hw_blk)
    w = w_ref[...]
    b = b_ref[...]
    b_blk = x_ref.shape[0]
    for i in range(b_blk):  # small, statically unrolled batch block
        # 1x1 conv == channel contraction on the MXU, f32 accumulation.
        z = jnp.dot(w, x_ref[i], preferred_element_type=jnp.float32) + b
        # Numerically-stable sigmoid: exp of a non-positive number only, so no inf
        # intermediates. VPU/EUP slack is large in a memory-bound kernel; the extra
        # where/exp/divide are fully hidden under the DMA.
        pos = z >= 0.0
        ez = jnp.exp(jnp.where(pos, -z, z))
        a = jnp.where(pos, 1.0 / (1.0 + ez), ez / (1.0 + ez))
        out_ref[i] = a.astype(out_ref.dtype)


# ---------------------------------------------------------------------------
# Block-size selection (VMEM-budget driven)
# ---------------------------------------------------------------------------
def _round_up(x, m):
    return ((x + m - 1) // m) * m


def _largest_divisor_at_most(n, cap):
    cap = max(1, min(n, cap))
    for d in range(cap, 0, -1):
        if n % d == 0:
            return d
    return 1


def _select_blocks(bs, c_in, c_out, hw, itemsize,
                   target_block_bytes=4 * 1024 * 1024):
    """Pick (b_blk, hw_blk, hw_steps, hw_pad) from a per-step VMEM budget.

    target_block_bytes bounds one (x + out) block. With default double-buffering
    the pipelined footprint is ~2x that plus the tiny resident weight/bias, which
    fits every generation's scoped-VMEM default (16 MiB v5e, 32 MiB v6e/v7x) with
    no compiler override, while strips stay large enough (multi-MiB) to amortize
    the ~0.35 us per-grid-step overhead.
    """
    hw_pad = _round_up(hw, 128)                     # lane-dense stores
    bytes_per_col = (c_in + c_out) * itemsize       # x + out traffic per column
    cols_cap = max(128, (target_block_bytes // bytes_per_col) // 128 * 128)

    if hw_pad <= cols_cap:
        # Whole (padded) spatial extent is one strip: amortize grid-step overhead
        # by packing several batch elements into each step.
        hw_blk, hw_steps = hw_pad, 1
        b_blk = _largest_divisor_at_most(bs, max(1, cols_cap // hw_pad))
    else:
        # Large feature map: split spatial into near-equal lane-aligned strips.
        hw_steps = -(-hw_pad // cols_cap)           # ceil
        hw_blk = _round_up(-(-hw_pad // hw_steps), 128)
        hw_pad = hw_blk * hw_steps
        b_blk = 1

    # Keep >= 2 parallel grid steps so both v7x TensorCores get work.
    if (bs // b_blk) * hw_steps < 2:
        if b_blk > 1:
            b_blk = _largest_divisor_at_most(bs, b_blk // 2)
        elif hw_pad >= 256 and hw_steps == 1:
            hw_steps = 2
            hw_blk = _round_up(-(-hw_pad // 2), 128)
            hw_pad = hw_blk * 2
        # else: bs == 1 and hw <= 128 — nothing worth splitting.

    return b_blk, hw_blk, hw_steps, hw_pad


# ---------------------------------------------------------------------------
# Wrapper
# ---------------------------------------------------------------------------
def spatial_attn_forward(x, w, bias, gamma, beta, running_mean, running_var,
                         eps=1e-5, target_block_bytes=4 * 1024 * 1024):
    """x: (bs, C_in, H, W); w: (C_out, C_in); bias/gamma/beta/mean/var: (C_out,)."""
    bs, c_in, h, wdt = x.shape
    c_out = w.shape[0]
    hw = h * wdt
    itemsize = jnp.dtype(x.dtype).itemsize

    # Fold eval-mode BatchNorm into the conv: scale into W, shift into bias.
    # The fold is done in f32 and the folded bias stays f32; only the matmul
    # operand (weight) is cast to the activation dtype.
    scale = gamma.astype(jnp.float32) / jnp.sqrt(running_var.astype(jnp.float32) + eps)
    shift = beta.astype(jnp.float32) - running_mean.astype(jnp.float32) * scale
    w_eff = (w.astype(jnp.float32) * scale[:, None]).astype(x.dtype)      # (C_out, C_in)
    b_eff = (bias.astype(jnp.float32) * scale + shift)[:, None]           # (C_out, 1) f32

    b_blk, hw_blk, hw_steps, hw_pad = _select_blocks(
        bs, c_in, c_out, hw, itemsize, target_block_bytes)

    # Flatten spatial; pad to hw_steps * hw_blk (a multiple of 128) so every store
    # is unmasked and lane-dense. The padded tail is stripped after the call.
    x2 = x.reshape(bs, c_in, hw)
    if hw_pad != hw:
        x2 = jnp.pad(x2, ((0, 0), (0, 0), (0, hw_pad - hw)))

    out = pl.pallas_call(
        spatial_attn_kernel,
        out_shape=jax.ShapeDtypeStruct((bs, c_out, hw_pad), x.dtype),
        grid=(bs // b_blk, hw_steps),
        in_specs=[
            pl.BlockSpec((b_blk, c_in, hw_blk), lambda bi, si: (bi, 0, si)),  # x strip
            pl.BlockSpec((c_out, c_in), lambda bi, si: (0, 0)),   # folded weight (resident)
            pl.BlockSpec((c_out, 1), lambda bi, si: (0, 0)),      # folded bias   (resident)
        ],
        out_specs=pl.BlockSpec((b_blk, c_out, hw_blk), lambda bi, si: (bi, 0, si)),
        compiler_params=pltpu.CompilerParams(
            dimension_semantics=("parallel", "parallel")),
    )(x2, w_eff, b_eff)

    if hw_pad != hw:
        out = out[:, :, :hw]
    return out.reshape(bs, c_out, h, wdt)


def spatial_attn_reference(x, w, bias, gamma, beta, running_mean, running_var, eps=1e-5):
    """Pure-JAX reference of the PyTorch forward (eval-mode BN)."""
    z = jnp.einsum('oc,bchw->bohw', w, x) + bias[None, :, None, None]
    inv = gamma / jnp.sqrt(running_var + eps)
    zn = (z - running_mean[None, :, None, None]) * inv[None, :, None, None] \
        + beta[None, :, None, None]
    return jax.nn.sigmoid(zn)


if __name__ == "__main__":
    eps = 1e-5

    def run_case(key, bs, c_in, c_out, H, W):
        kx, kw, kb, kg, kbt, km, kv = jax.random.split(key, 7)
        x = jax.random.normal(kx, (bs, c_in, H, W), dtype=jnp.float32)
        # Conv2d(in_channels, number, 1): weight (number, in_channels, 1, 1) -> 2-D
        w = jax.random.normal(kw, (c_out, c_in), jnp.float32) * (1.0 / math.sqrt(c_in))
        bias = jax.random.normal(kb, (c_out,), jnp.float32) * 0.1
        # BatchNorm2d(number), eval mode — non-trivial stats to exercise the fold.
        gamma = 1.0 + 0.1 * jax.random.normal(kg, (c_out,), jnp.float32)
        beta = 0.1 * jax.random.normal(kbt, (c_out,), jnp.float32)
        running_mean = 0.1 * jax.random.normal(km, (c_out,), jnp.float32)
        running_var = jax.random.uniform(kv, (c_out,), jnp.float32, minval=0.5, maxval=1.5)

        out = spatial_attn_forward(x, w, bias, gamma, beta, running_mean, running_var, eps)
        out = jax.block_until_ready(out)

        ref = spatial_attn_reference(x, w, bias, gamma, beta, running_mean, running_var, eps)
        assert out.shape == (bs, c_out, H, W)
        max_err = jnp.max(jnp.abs(out - ref))
        assert jnp.allclose(out, ref, atol=1e-4, rtol=1e-4), f"max abs err {max_err}"

    k1, k2 = jax.random.split(jax.random.PRNGKey(0))
    # SpatialAttn(in_channels=128, number=8) on a 16x16 map (lane-aligned path).
    run_case(k1, bs=2, c_in=128, c_out=8, H=16, W=16)
    # 14x14 map (H*W not a multiple of 128) with batch blocking: exercises the
    # padding path and the multi-batch-per-step path.
    run_case(k2, bs=8, c_in=32, c_out=4, H=14, W=14)

    print("KERNEL_OK")
</pallas_src>

<mosaic_0001>
module attributes {stable_mosaic.version = 11 : i64} {
  func.func @spatial_attn_kernel(%arg0: i32, %arg1: i32, %arg2: memref<1x128x256xf32, #tpu.memory_space<vmem>>, %arg3: memref<8x128xf32, #tpu.memory_space<vmem>>, %arg4: memref<8x1xf32, #tpu.memory_space<vmem>>, %arg5: memref<1x8x256xf32, #tpu.memory_space<vmem>>) attributes {dimension_semantics = [#tpu.dimension_semantics<parallel>, #tpu.dimension_semantics<parallel>], iteration_bounds = array<i64: 2, 1>, scalar_prefetch = 0 : i64, scratch_operands = 0 : i64, tpu.core_type = #tpu.core_type<tc>, window_params = [{transform_indices = @transform_0, window_bounds = array<i64: 1, 128, 256>}, {pipeline_mode = #tpu.pipeline_mode<synchronous>, transform_indices = @transform_1, window_bounds = array<i64: 8, 128>}, {pipeline_mode = #tpu.pipeline_mode<synchronous>, transform_indices = @transform_2, window_bounds = array<i64: 8, 1>}, {transform_indices = @transform_3, window_bounds = array<i64: 1, 8, 256>}]} {
    %c0 = arith.constant 0 : index
    %c0_0 = arith.constant 0 : index
    %0 = vector.load %arg3[%c0, %c0_0] : memref<8x128xf32, #tpu.memory_space<vmem>>, vector<8x128xf32>
    %c0_1 = arith.constant 0 : index
    %c0_2 = arith.constant 0 : index
    %1 = vector.load %arg4[%c0_1, %c0_2] : memref<8x1xf32, #tpu.memory_space<vmem>>, vector<8x1xf32>
    %c0_3 = arith.constant 0 : index
    %c0_4 = arith.constant 0 : index
    %c0_5 = arith.constant 0 : index
    %2 = vector.load %arg2[%c0_3, %c0_4, %c0_5] : memref<1x128x256xf32, #tpu.memory_space<vmem>>, vector<1x128x256xf32>
    %3 = vector.shape_cast %2 : vector<1x128x256xf32> to vector<128x256xf32>
    %cst = arith.constant dense<0.000000e+00> : vector<8x256xf32>
    %4 = tpu.matmul %0, %3, %cst {dimension_numbers = #tpu.dot_dimension_numbers<[1], [0], [0], [1], [0, 0, 1, 1], [], []>} : vector<8x128xf32>, vector<128x256xf32>, vector<8x256xf32> -> vector<8x256xf32>
    %5 = vector.broadcast %1 : vector<8x1xf32> to vector<8x256xf32>
    %6 = arith.addf %4, %5 : vector<8x256xf32>
    %cst_6 = arith.constant 0.000000e+00 : f32
    %7 = vector.broadcast %cst_6 : f32 to vector<8x256xf32>
    %8 = arith.cmpf oge, %6, %7 : vector<8x256xf32>
    %cst_7 = arith.constant 0.000000e+00 : f32
    %9 = vector.broadcast %cst_7 : f32 to vector<8x256xf32>
    %10 = arith.subf %9, %6 : vector<8x256xf32>
    %11 = arith.select %8, %10, %6 : vector<8x256xi1>, vector<8x256xf32>
    %12 = math.exp %11 : vector<8x256xf32>
    %cst_8 = arith.constant 1.000000e+00 : f32
    %13 = vector.broadcast %cst_8 : f32 to vector<8x256xf32>
    %14 = arith.addf %13, %12 : vector<8x256xf32>
    %cst_9 = arith.constant 1.000000e+00 : f32
    %15 = vector.broadcast %cst_9 : f32 to vector<8x256xf32>
    %16 = arith.divf %15, %14 : vector<8x256xf32>
    %cst_10 = arith.constant 1.000000e+00 : f32
    %17 = vector.broadcast %cst_10 : f32 to vector<8x256xf32>
    %18 = arith.addf %17, %12 : vector<8x256xf32>
    %19 = arith.divf %12, %18 : vector<8x256xf32>
    %20 = arith.select %8, %16, %19 : vector<8x256xi1>, vector<8x256xf32>
    %c0_11 = arith.constant 0 : index
    %c0_12 = arith.constant 0 : index
    %c0_13 = arith.constant 0 : index
    %21 = vector.load %arg5[%c0_11, %c0_12, %c0_13] : memref<1x8x256xf32, #tpu.memory_space<vmem>>, vector<1x8x256xf32>
    %22 = vector.shape_cast %21 : vector<1x8x256xf32> to vector<8x256xf32>
    %23 = vector.shape_cast %20 : vector<8x256xf32> to vector<1x8x256xf32>
    tpu.vector_store %arg5[%c0_11, %c0_12, %c0_13], %23 {strides = array<i32>} : memref<1x8x256xf32, #tpu.memory_space<vmem>>, vector<1x8x256xf32>,
    return
  }
  func.func @transform_0(%arg0: i32, %arg1: i32) -> (i32, i32, i32) {
    %c0_i32 = arith.constant 0 : i32
    %c0_i32_0 = arith.constant 0 : i32
    return %arg0, %c0_i32, %arg1 : i32, i32, i32
  }
  func.func @transform_1(%arg0: i32, %arg1: i32) -> (i32, i32) {
    %c0_i32 = arith.constant 0 : i32
    %c0_i32_0 = arith.constant 0 : i32
    %c0_i32_1 = arith.constant 0 : i32
    return %c0_i32, %c0_i32_0 : i32, i32
  }
  func.func @transform_2(%arg0: i32, %arg1: i32) -> (i32, i32) {
    %c0_i32 = arith.constant 0 : i32
    %c0_i32_0 = arith.constant 0 : i32
    %c0_i32_1 = arith.constant 0 : i32
    return %c0_i32, %c0_i32_0 : i32, i32
  }
  func.func @transform_3(%arg0: i32, %arg1: i32) -> (i32, i32, i32) {
    %c0_i32 = arith.constant 0 : i32
    %c0_i32_0 = arith.constant 0 : i32
    return %arg0, %c0_i32, %arg1 : i32, i32, i32
  }
}

</mosaic_0001>

<bundles_post_ra>
// kernel: tpu_custom_call.1
= control target key start
LH: loop header
LB: loop body
LE: loop exit
PB: predicated region body
PF: predicated region fallthrough
CT: control target
= control target key end

     0   :  { %8 = vsyncpa [#allocation3], 0  ;;  %s924_s0 = inlined_call_operand.hbm [shape: f32[2,128,256], index: 0, kind: input, shape index: {}]   ;;  %s925_s1 = inlined_call_operand.vmem [shape: f32[8,128], index: 1, kind: input, shape index: {}]   ;;  %s926_s2 = inlined_call_operand.vmem [shape: f32[8,1], index: 2, kind: input, shape index: {}]   ;;  %s927_s3 = inlined_call_operand.hbm [shape: f32[2,8,256], index: 3, kind: output, shape index: {}]  }
   0x1   :  { %10 = vsyncpa [#allocation3 + $0x1], 0 }
   0x2   :  { %11 = vsyncpa [#allocation4], 0 }
   0x3   :  { %13 = vsyncpa [#allocation4 + $0x1], 0  ;;  %s706_s12 = smov 0   ;;  %s708_s13 = smov 0  }
   0x4   :  { %s710_s14 = smov 0   ;;  %s712_s15 = smov 0  }
   0x5   :  { %s714_s16 = smov 0   ;;  %s716_s17 = smov 0  }
   0x6 LB: > { %s442_s18 = sadd.s32 4294967295, %s678_s17   ;;  %s443_s19 = sadd.s32 4294967294, %s678_s17   ;;  %s678_s17 = sphi %s716_s17, %s19_s17   ;;  %s674_s16 = sphi %s714_s16, %s942_s16   ;;  %s670_s15 = sphi %s712_s15, %s941_s15   ;;  %s666_s14 = sphi %s710_s14, %s940_s14   ;;  %s662_s13 = sphi %s708_s13, %s939_s13   ;;  %s658_s12 = sphi %s706_s12, %s938_s12  }
   0x7   : > { %s31_s20 = sadd.s32 1, %s674_s16  ;;  %s40_s21 = sadd.s32 1, %s666_s14 }
   0x8   : > { %p33_p0 = scmp.ge.s32.totalorder %s31_s20, 2  ;;  %p47_p1 = scmp.ne.s32.totalorder %s666_s14, %s662_s13 }
   0x9   : > { %p48_p2 = scmp.eq.s32.totalorder %s678_s17, 0  ;;  %p53_p3 = scmp.ne.s32.totalorder %s662_s13, %s658_s12 }
   0xa   : > { %s944_s20 = smov (%p33_p0, %s31_s20), 0  ;;  %p54_p5 = scmp.eq.s32.totalorder %s442_s18, 0 }
   0xb   : > { %p747_p4 = por %p48_p2, %p47_p1  ;;  %s35_s23 = ssub.s32 %s674_s16, %s944_s20 }
   0xc   : > { %p121_p6 = scmp.eq.s32.totalorder %s442_s18, 1  ;;  %p38_p7 = scmp.eq.s32.totalorder %s35_s23, 0 }
   0xd   : > { %p753_p8 = por %p54_p5, %p53_p3  ;;  %p127_p10 = scmp.eq.s32.totalorder %s443_s19, 1 }
   0xe   : > { %p757_p9 = por %p121_p6, %p47_p1  ;;  %p503_p13 = scmp.lt.s32.totalorder %s678_s17, 2 }
   0xf   : > { %s762_s26 = scalar_select %p38_p7, %s666_s14, %s40_s21  }
  0x10   : > { %s931_s25 = scalar_select %p757_p9, 1, 0 }
  0x11   : > { %p764_p11 = por %p127_p10, %p53_p3  ;;  %s153_s28 = sand.u32 1, %s666_s14  }
  0x12   : > { %s446_s29 = sshll.u32 %s153_s28, 8  ;;  %s457_s30 = sshll.u32 %s674_s16, 12 }
  0x13   : > { %s932_s27 = scalar_select %p764_p11, 1, 0 }
  0x14   : > { %s775_s6 = scalar_lea.hbm %s924_s0, %s457_s30  ;;  %s157_s7 = scalar_lea.vmem [#allocation2], %s446_s29 }
  0x15   : > { %s166_s8 = sshll.u32 %s157_s7, 4  ;;  %p781_p0 = pnand %p503_p13, %p747_p4  ;;  %s777_s8 = int_to_ptr.vmem [resolvable:$true] %s166_s8 }
  0x16   : > { %s786_s10 = scalar_lea.sflag [#allocation3], %s153_s28  ;;  %s566_s11 = scalar_lea.hbm %s775_s6, 4096 }
  0x17   : > { %p567_p2 = scmp.ne.s32.totalorder %s775_s6, %s566_s11  ;;  %p568_p3 = pneg %p781_p0 }
  0x18   : > { %s571_s21 = scalar_lea.hbm %s924_s0, 8192  ;;  %p572_p4 = scmp.lt.u32.totalorder %s775_s6, %s924_s0 }
  0x19   : > { %p569_p5 = pnand %p568_p3, %p567_p2  ;;  %p573_p7 = scmp.lt.u32.totalorder %s571_s21, %s566_s11 }
  0x1a   : > { %p575_p13 = scmp.lt.u32.totalorder %s566_s11, %s775_s6 }
  0x1b   : > { %p570_p6 = pneg %p569_p5  ;;  %p574_p10 = por %p573_p7, %p572_p4 }
  0x1d   : > { %p576_p12 = por %p575_p13, %p574_p10 }
  0x1f   : > { %p577_p1 = pnand %p576_p12, %p570_p6 }
  0x21   : > { %580 = shalt.err (!%p577_p1)
}
  0x22   : > { %s581_s28 = scalar_lea.vmem %s777_s8, 4096  ;;  %s680_s29 = smov [#allocation2]  }
  0x23   : > { %p582_p2 = scmp.ne.s32.totalorder %s777_s8, %s581_s28  ;;  %s586_s30 = sshll.u32 %s680_s29, 4  ;;  %s587_s30 = int_to_ptr.vmem [resolvable:$false] %s586_s30 }
  0x24   : > { %s588_s4 = scalar_lea.vmem %s587_s30, 8192  ;;  %p589_p9 = scmp.lt.s32.totalorder %s777_s8, %s587_s30 }
  0x25   : > { %p584_p5 = pnand %p582_p2, %p568_p3  ;;  %p590_p4 = scmp.lt.s32.totalorder %s588_s4, %s581_s28 }
  0x27   : > { %p585_p11 = pneg %p584_p5  ;;  %p591_p7 = por %p590_p4, %p589_p9 }
  0x29   : > { %p592_p10 = pnand %p591_p7, %p585_p11 }
  0x2b   : > { %595 = shalt.err (!%p592_p10)
}
  0x2c   : > { %s681_s5 = smov 256   ;;  %s682_s7 = smov 16  }
  0x2d   : > { %498 = dma.hbm_to_vmem [thread:$0]  (!%p781_p0), %s775_s6, 4096, %s777_s8, %s786_s10, %s681_s5, %s681_s5, %s682_s7  }
  0x2e   : > { %p174_p12 = scmp.lt.s32.totalorder %s678_s17, 3  ;;  %p934_p1 = scmp.ge.s32.totalorder %s678_s17, 1 }
  0x30   : > { %p175_p3 = pnand %p934_p1, %p174_p12 }
  0x31   : > { %s818_s11 = sand.u32 (!%p175_p3), 1, %s662_s13  }
  0x32   : > { %178 = sbr.rel (%p175_p3) target bundleno = 354 (0x162), region = 32  ;;  %s450_s18 = sshll.u32 (!%p175_p3), %s818_s11, 8 }
  0x33   : > { %s181_s19 = scalar_lea.sflag (!%p175_p3), [#allocation3], %s818_s11  ;;  %s822_s21 = scalar_lea.vmem (!%p175_p3), [#allocation2], %s450_s18 }
  0x39   : > { %649 = dma.done.wait (%p753_p8), %s181_s19, 4096  }
  0x3a   : > { %651 = vsyncadd (%p753_p8), %s181_s19, 4294963200  ;;  %v683_v0 = vmov 0.0   ;;  %v684_v1 = vmov 0   ;;  %v212_v2 = vld [vmem:[%s822_s21 + $0x8] sm:$0xff]  ;;  %v214_v3 = vld [vmem:[%s822_s21 + $0x18] sm:$0xff]  ;;  %s451_s10 = sshll.u32 %s818_s11, 4 }
  0x3b   : > { %312 = vmatprep.mubr.f32.mxu0 %v683_v0  ;;  %557 = vset.pattern.permute.xlu0 %v684_v1  ;;  %v211_v4 = vld [vmem:[%s822_s21] sm:$0xff]  ;;  %v459_v5 = vpack.c.bf16 %v214_v3, %v212_v2  ;;  %v213_v6 = vld [vmem:[%s822_s21 + $0x10] sm:$0xff]  ;;  %v216_v7 = vld [vmem:[%s822_s21 + $0x28] sm:$0xff]  ;;  %s458_s22 = sshll.u32 %s670_s15, 8  ;;  %s206_s23 = scalar_lea.vmem [#allocation5], %s451_s10 }
  0x3c   : > { %v218_v8 = vld [vmem:[%s822_s21 + $0x38] sm:$0xff]  ;;  %v461_v9 = vpack.c.bf16 %v213_v6, %v211_v4  ;;  %v215_v11 = vld [vmem:[%s822_s21 + $0x20] sm:$0xff]  ;;  %v217_v12 = vld [vmem:[%s822_s21 + $0x30] sm:$0xff]  ;;  %s358_s28 = sshll.u32 %s206_s23, 4  ;;  %s874_s4 = scalar_lea.hbm %s927_s3, %s458_s22  ;;  %s876_s28 = int_to_ptr.vmem [resolvable:$true] %s358_s28 }
  0x3d   : > { %v463_v10 = vpack.c.bf16 %v218_v8, %v216_v7  ;;  %v220_v13 = vld [vmem:[%s822_s21 + $0x48] sm:$0xff]  ;;  %460 = vmatprep.subr.bf16.mxu0 %v459_v5  ;;  %v222_v14 = vld [vmem:[%s822_s21 + $0x58] sm:$0xff]  ;;  %v465_v15 = vpack.c.bf16 %v217_v12, %v215_v11  ;;  %v219_v17 = vld [vmem:[%s822_s21 + $0x40] sm:$0xff]  ;;  %s342_s15 = scalar_lea.sflag [#allocation4], %s818_s11  ;;  %s596_s5 = scalar_lea.vmem %s876_s28, 256 }
  0x3e   : > { %462 = vmatpush1.bf16.msra.mxu0 %v461_v9  ;;  %v467_v16 = vpack.c.bf16 %v222_v14, %v220_v13  ;;  %v221_v18 = vld [vmem:[%s822_s21 + $0x50] sm:$0xff]  ;;  %v224_v19 = vld [vmem:[%s822_s21 + $0x68] sm:$0xff]  ;;  %v226_v20 = vld [vmem:[%s822_s21 + $0x78] sm:$0xff]  ;;  %p597_p8 = scmp.ne.s32.totalorder %s876_s28, %s596_s5  ;;  %p935_p9 = scmp.ne.s32.totalorder %s931_s25, 0 }
  0x3f   : > { %464 = vmatprep.subr.bf16.mxu0 %v463_v10  ;;  %v469_v21 = vpack.c.bf16 %v221_v18, %v219_v17  ;;  %v471_v22 = vpack.c.bf16 %v226_v20, %v224_v19  ;;  %v223_v23 = vld [vmem:[%s822_s21 + $0x60] sm:$0xff]  ;;  %v225_v24 = vld [vmem:[%s822_s21 + $0x70] sm:$0xff]  ;;  %v228_v25 = vld [vmem:[%s822_s21 + $0x88] sm:$0xff]  ;;  %s685_s7 = smov [#allocation5]  }
  0x40   : > { %v230_v26 = vld [vmem:[%s822_s21 + $0x98] sm:$0xff]  ;;  %v210_v27 = vld [vmem:[%s926_s2] sm:$0xff]  ;;  %v473_v28 = vpack.c.bf16 %v225_v24, %v223_v23  ;;  %v229_v31 = vld [vmem:[%s822_s21 + $0x90] sm:$0xff]  ;;  %p598_p11 = pnand %p597_p8, %p935_p9  ;;  %s600_s18 = sshll.u32 %s685_s7, 4  ;;  %s601_s18 = int_to_ptr.vmem [resolvable:$false] %s600_s18 }
  0x41   : > { %245 = vperm.xlu0 %557, %v210_v27   ;;  %v475_v29 = vpack.c.bf16 %v230_v26, %v228_v25  ;;  %v227_v30 = vld [vmem:[%s822_s21 + $0x80] sm:$0xff]  ;;  %v232_v32 = vld [vmem:[%s822_s21 + $0xa8] sm:$0xff]  ;;  %v234_v33 = vld [vmem:[%s822_s21 + $0xb8] sm:$0xff]  ;;  %s602_s19 = scalar_lea.vmem %s601_s18, 512  ;;  %p603_p6 = scmp.lt.s32.totalorder %s876_s28, %s601_s18 }
  0x42   : > { %466 = vmatpush1.bf16.msra.mxu0 %v465_v15  ;;  %v477_v34 = vpack.c.bf16 %v229_v31, %v227_v30  ;;  %v479_v35 = vpack.c.bf16 %v234_v33, %v232_v32  ;;  %v231_v36 = vld [vmem:[%s822_s21 + $0xa0] sm:$0xff]  ;;  %v233_v37 = vld [vmem:[%s822_s21 + $0xb0] sm:$0xff]  ;;  %v236_v38 = vld [vmem:[%s822_s21 + $0xc8] sm:$0xff]  ;;  %p599_p0 = pneg %p598_p11  ;;  %p604_p13 = scmp.lt.s32.totalorder %s602_s19, %s596_s5 }
  0x43   : > { %468 = vmatprep.subr.bf16.mxu0 %v467_v16  ;;  %v238_v39 = vld [vmem:[%s822_s21 + $0xd8] sm:$0xff]  ;;  %v481_v40 = vpack.c.bf16 %v233_v37, %v231_v36  ;;  %v235_v42 = vld [vmem:[%s822_s21 + $0xc0] sm:$0xff]  ;;  %v237_v43 = vld [vmem:[%s822_s21 + $0xd0] sm:$0xff] }
  0x44   : > { %v483_v41 = vpack.c.bf16 %v238_v39, %v236_v38  ;;  %v240_v44 = vld [vmem:[%s822_s21 + $0xe8] sm:$0xff]  ;;  %v242_v45 = vld [vmem:[%s822_s21 + $0xf8] sm:$0xff]  ;;  %v485_v46 = vpack.c.bf16 %v237_v43, %v235_v42  ;;  %v239_v48 = vld [vmem:[%s822_s21 + $0xe0] sm:$0xff]  ;;  %p605_p2 = por %p604_p13, %p603_p6 }
  0x45   : > { %v487_v47 = vpack.c.bf16 %v242_v45, %v240_v44  ;;  %v241_v49 = vld [vmem:[%s822_s21 + $0xf0] sm:$0xff]  ;;  %v209_v51 = vld [vmem:[%s925_s1] sm:$0xff] }
  0x46   : > { %470 = vmatpush1.bf16.msra.mxu0 %v469_v21  ;;  %v489_v50 = vpack.c.bf16 %v241_v49, %v239_v48  ;;  %p606_p5 = pnand %p605_p2, %p599_p0 }
  0x47   : > { %472 = vmatprep.subr.bf16.mxu0 %v471_v22 }
  0x4a   : > { %474 = vmatpush1.bf16.msra.mxu0 %v473_v28 }
  0x4b   : > { %476 = vmatprep.subr.bf16.mxu0 %v475_v29 }
  0x4e   : > { %478 = vmatpush1.bf16.msra.mxu0 %v477_v34 }
  0x4f   : > { %480 = vmatprep.subr.bf16.mxu0 %v479_v35 }
  0x52   : > { %482 = vmatpush1.bf16.msra.mxu0 %v481_v40 }
  0x53   : > { %484 = vmatprep.subr.bf16.mxu0 %v483_v41 }
  0x56   : > { %486 = vmatpush1.bf16.msra.mxu0 %v485_v46 }
  0x57   : > { %488 = vmatprep.subr.bf16.mxu0 %v487_v47 }
  0x5a   : > { %490 = vmatpush1.bf16.msra.mxu0 %v489_v50 }
  0x5d   : > { %313 = vmatmul.mubr.f32.vlgmr.msra.gmra.mrb[0].mxu0 %v209_v51 }
  0xc0   : > { %v246_v52 = vpop.permute.xlu0 %245 }
 0x130   : > { %v314_v53 = vpop.f32.mrb[0].mxu0 }
 0x131   : > { %v315_v54 = vadd.f32 %v314_v53, %v246_v52  ;;  %v316_v55 = vpop.f32.mrb[1].mxu0 }
 0x132   : > { %v317_v56 = vadd.f32 %v316_v55, %v246_v52 }
 0x133   : > { %vm319_vm0 = vcmp.ge.f32.partialorder %v315_v54, 0.0  ;;  %v321_v57 = vsub.f32 0.0, %v315_v54 }
 0x134   : > { %vm320_vm1 = vcmp.ge.f32.partialorder %v317_v56, 0.0  ;;  %v322_v58 = vsub.f32 0.0, %v317_v56 }
 0x135   : > { %v323_v59 = vsel %vm319_vm0, %v321_v57, %v315_v54 }
 0x136   : > { %v325_v60 = vmul.f32 1.442695, %v323_v59  ;;  %v324_v61 = vsel %vm320_vm1, %v322_v58, %v317_v56 }
 0x137   : > { %v327_v62 = vmul.f32 1.442695, %v324_v61 }
 0x138   : > { %558 = vpow2.f32 %v325_v60 }
 0x139   : > { %560 = vpow2.f32 %v327_v62 }
 0x142   : > { %v559_v63 = vpop.eup %558 }
 0x143   : > { %v561_v0 = vpop.eup %560  ;;  %v329_v1 = vadd.f32 1.0, %v559_v63 }
 0x144   : > { %v330_v2 = vadd.f32 1.0, %v561_v0 }
 0x145   : > { %562 = vrcp.f32 %v329_v1 }
 0x146   : > { %564 = vrcp.f32 %v330_v2 }
 0x14f   : > { %v563_v3 = vpop.eup %562 }
 0x150   : > { %v565_v4 = vpop.eup %564  ;;  %v335_v5 = vmul.f32 %v563_v3, %v559_v63 }
 0x151   : > { %v336_v6 = vmul.f32 %v565_v4, %v561_v0 }
 0x152   : > { %v337_v7 = vsel %vm319_vm0, %v563_v3, %v335_v5 }
 0x153   : > { %v338_v8 = vsel %vm320_vm1, %v565_v4, %v336_v6  ;;  %339 = vst [vmem:[%s206_s23] sm:$0xff] %v337_v7 }
 0x154   : > { %340 = vst [vmem:[%s206_s23 + $0x8] sm:$0xff] %v338_v8 }
 0x155   : > { %609 = shalt.err (!%p606_p5)
}
 0x156   : > { %s610_s11 = scalar_lea.hbm %s874_s4, 256  ;;  %s614_s6 = scalar_lea.hbm %s927_s3, 512 }
 0x157   : > { %p611_p4 = scmp.ne.s32.totalorder %s874_s4, %s610_s11  ;;  %p615_p12 = scmp.lt.u32.totalorder %s874_s4, %s927_s3 }
 0x158   : > { %p616_p1 = scmp.lt.u32.totalorder %s614_s6, %s610_s11  ;;  %p618_p8 = scmp.lt.u32.totalorder %s610_s11, %s874_s4 }
 0x159   : > { %p612_p7 = pnand %p611_p4, %p935_p9 }
 0x15a   : > { %p617_p3 = por %p616_p1, %p615_p12 }
 0x15b   : > { %p613_p10 = pneg %p612_p7 }
 0x15c   : > { %p619_p11 = por %p618_p8, %p617_p3 }
 0x15e   : > { %p620_p0 = pnand %p619_p11, %p613_p10 }
 0x160   : > { %623 = shalt.err (!%p620_p0)
}
 0x161   : > { %493 = dma.vmem_to_hbm [thread:$0]  (%p935_p9), %s876_s28, 256, %s874_s4, %s342_s15  }
 0x162 PF: > { %s370_s10 = sand.u32 1, %s658_s12   ;;  %p936_p6 = scmp.ne.s32.totalorder %s932_s27, 0 }
 0x163   : > { %p937_p13 = scmp.ge.s32.totalorder %s678_s17, 2  ;;  %s371_s22 = scalar_lea.sflag [#allocation4], %s370_s10 }
 0x165   : > { %p500_p2 = pnand %p937_p13, %p936_p6 }
 0x167   : > { %653 = dma.done.wait (!%p500_p2), %s371_s22, 256  }
 0x168   : > { %655 = vsyncadd (!%p500_p2), %s371_s22, 4294967040  ;;  %s19_s17 = sadd.s32 1, %s678_s17   ;;  %s938_s12 = smov %s662_s13 }
 0x169   : > { %p16_p5 = scmp.ge.s32.totalorder %s19_s17, 4   ;;  %s939_s13 = smov %s666_s14 }
 0x16a   : > { %s940_s14 = smov %s762_s26  ;;  %s941_s15 = smov %s674_s16 }
 0x16b   : > { %s942_s16 = smov %s944_s20  ;;  %18 = sbr.rel (!%p16_p5) target bundleno = 6 (0x6), region = 77 }
 0x172   :  { %376 = vsyncpa [#allocation3], 1 }
 0x173   :  { %378 = vsyncpa [#allocation3 + $0x1], 1 }
 0x174   :  { %379 = vsyncpa [#allocation4], 1 }
 0x175   :  { %381 = vsyncpa [#allocation4 + $0x1], 1 }

</bundles_post_ra>
